<compile_context>
chip_gen: v7x
topology: tpu7x:2x2x1
jax: 0.10.0
libtpu: 0.0.40
codegen_flags: <defaults>
</compile_context>

<pallas_src>
import jax
import jax.numpy as jnp
from jax.experimental import pallas as pl
from jax.experimental.pallas import tpu as pltpu

HIDDEN = 256
LANE = 128


def _round_up(x, m):
    return ((x + m - 1) // m) * m


def _actor_kernel(ma_ref, x_ref, w1_ref, b1_ref, w2_ref, b2_ref, w3_ref,
                  b3_ref, o_ref):
    max_action = ma_ref[0, 0]
    # Layer 1: (T, S) @ (S, 256) + (1, 256) -> relu   (bf16 MXU, f32 accum)
    a = jnp.dot(x_ref[...].astype(jnp.bfloat16), w1_ref[...],
                preferred_element_type=jnp.float32)
    a = jnp.maximum(a + b1_ref[...], 0.0)
    # Layer 2: (T, 256) @ (256, 256) + (1, 256) -> relu
    a = jnp.dot(a.astype(jnp.bfloat16), w2_ref[...],
                preferred_element_type=jnp.float32)
    a = jnp.maximum(a + b2_ref[...], 0.0)
    # Layer 3: (T, 256) @ (256, A_pad) + (1, A_pad) -> max_action * tanh
    a = jnp.dot(a.astype(jnp.bfloat16), w3_ref[...],
                preferred_element_type=jnp.float32)
    o_ref[...] = (max_action * jnp.tanh(a + b3_ref[...])).astype(o_ref.dtype)


def actor_forward(state, params, max_action, *, tile_b=1024):
    """Pallas forward pass. state: (B, state_dim) float32."""
    w1, b1, w2, b2, w3, b3 = params
    batch, state_dim = state.shape
    action_dim = w3.shape[1]

    # Lane-dense output: pad the last layer to a multiple of 128 features.
    out_pad = _round_up(action_dim, LANE)
    if out_pad != action_dim:
        w3 = jnp.pad(w3, ((0, 0), (0, out_pad - action_dim)))
        b3 = jnp.pad(b3, ((0, 0), (0, out_pad - action_dim)))

    # bf16 weights into the MXU; accumulation stays f32 inside the kernel.
    w1 = w1.astype(jnp.bfloat16)
    w2 = w2.astype(jnp.bfloat16)
    w3 = w3.astype(jnp.bfloat16)

    # Batch tiling: multiple of 8 sublanes, padded so the grid divides evenly.
    tile = _round_up(min(tile_b, _round_up(batch, 8)), 8)
    padded_batch = _round_up(batch, tile)
    if padded_batch != batch:
        state = jnp.pad(state, ((0, padded_batch - batch), (0, 0)))
    grid = (padded_batch // tile,)

    ma = jnp.full((1, 1), max_action, jnp.float32)

    const = lambda i: (0, 0)  # weights/biases: same block every grid step

    out_padded = pl.pallas_call(
        _actor_kernel,
        out_shape=jax.ShapeDtypeStruct((padded_batch, out_pad), jnp.float32),
        grid=grid,
        in_specs=[
            pl.BlockSpec(memory_space=pltpu.MemorySpace.SMEM),    # max_action
            pl.BlockSpec((tile, state_dim), lambda i: (i, 0)),    # state tile
            pl.BlockSpec((state_dim, HIDDEN), const),             # w1 (resident)
            pl.BlockSpec((1, HIDDEN), const),                     # b1
            pl.BlockSpec((HIDDEN, HIDDEN), const),                # w2
            pl.BlockSpec((1, HIDDEN), const),                     # b2
            pl.BlockSpec((HIDDEN, out_pad), const),               # w3 (padded)
            pl.BlockSpec((1, out_pad), const),                    # b3 (padded)
        ],
        out_specs=pl.BlockSpec((tile, out_pad), lambda i: (i, 0)),
        compiler_params=pltpu.CompilerParams(
            dimension_semantics=("parallel",),
            vmem_limit_bytes=32 * 1024 * 1024,
        ),
    )(ma, state, w1, b1, w2, b2, w3, b3)

    return out_padded[:batch, :action_dim]


def init_actor_params(key, state_dim, action_dim):
    """Deterministic synthetic init (shapes match nn.Linear layers, pre-transposed)."""
    ks = jax.random.split(key, 6)
    w1 = jax.random.normal(ks[0], (state_dim, HIDDEN), jnp.float32) * 0.05
    b1 = jax.random.normal(ks[1], (1, HIDDEN), jnp.float32) * 0.05
    w2 = jax.random.normal(ks[2], (HIDDEN, HIDDEN), jnp.float32) * 0.05
    b2 = jax.random.normal(ks[3], (1, HIDDEN), jnp.float32) * 0.05
    w3 = jax.random.normal(ks[4], (HIDDEN, action_dim), jnp.float32) * 0.05
    b3 = jax.random.normal(ks[5], (1, action_dim), jnp.float32) * 0.05
    return (w1, b1, w2, b2, w3, b3)


def actor_ref(state, params, max_action):
    """Plain-JAX f32 reference for correctness check."""
    w1, b1, w2, b2, w3, b3 = params
    a = jnp.maximum(state @ w1 + b1, 0.0)
    a = jnp.maximum(a @ w2 + b2, 0.0)
    return max_action * jnp.tanh(a @ w3 + b3)


if __name__ == "__main__":
    key = jax.random.PRNGKey(0)
    k_params, k_state = jax.random.split(key)

    batch = 8          # NOTE: at this size the call is launch-overhead bound;
    state_dim = 32     # stack many env/ensemble evaluations per call in practice.
    action_dim = 8
    max_action = 2.0

    params = init_actor_params(k_params, state_dim, action_dim)
    state = jax.random.normal(k_state, (batch, state_dim), jnp.float32)

    out = actor_forward(state, params, max_action)
    out = jax.block_until_ready(out)

    ref = actor_ref(state, params, max_action)
    assert out.shape == (batch, action_dim)
    # bf16 MXU operands with f32 accumulation -> loosened tolerance vs f32 ref.
    assert jnp.allclose(out, ref, atol=5e-2, rtol=5e-2), "mismatch vs reference"

    print("KERNEL_OK")
</pallas_src>

<mosaic_0001>
module attributes {stable_mosaic.version = 11 : i64} {
  func.func @_actor_kernel(%arg0: i32, %arg1: memref<1x1xf32, #tpu.memory_space<smem>>, %arg2: memref<8x32xf32, #tpu.memory_space<vmem>>, %arg3: memref<32x256xbf16, #tpu.memory_space<vmem>>, %arg4: memref<1x256xf32, #tpu.memory_space<vmem>>, %arg5: memref<256x256xbf16, #tpu.memory_space<vmem>>, %arg6: memref<1x256xf32, #tpu.memory_space<vmem>>, %arg7: memref<256x128xbf16, #tpu.memory_space<vmem>>, %arg8: memref<1x128xf32, #tpu.memory_space<vmem>>, %arg9: memref<8x128xf32, #tpu.memory_space<vmem>>) attributes {dimension_semantics = [#tpu.dimension_semantics<parallel>], iteration_bounds = array<i64: 1>, scalar_prefetch = 0 : i64, scratch_operands = 0 : i64, tpu.core_type = #tpu.core_type<tc>, window_params = [{transform_indices = @transform_0, window_bounds = array<i64: 1, 1>}, {transform_indices = @transform_1, window_bounds = array<i64: 8, 32>}, {pipeline_mode = #tpu.pipeline_mode<synchronous>, transform_indices = @transform_2, window_bounds = array<i64: 32, 256>}, {pipeline_mode = #tpu.pipeline_mode<synchronous>, transform_indices = @transform_3, window_bounds = array<i64: 1, 256>}, {pipeline_mode = #tpu.pipeline_mode<synchronous>, transform_indices = @transform_4, window_bounds = array<i64: 256, 256>}, {pipeline_mode = #tpu.pipeline_mode<synchronous>, transform_indices = @transform_5, window_bounds = array<i64: 1, 256>}, {pipeline_mode = #tpu.pipeline_mode<synchronous>, transform_indices = @transform_6, window_bounds = array<i64: 256, 128>}, {pipeline_mode = #tpu.pipeline_mode<synchronous>, transform_indices = @transform_7, window_bounds = array<i64: 1, 128>}, {transform_indices = @transform_8, window_bounds = array<i64: 8, 128>}]} {
    %c0 = arith.constant 0 : index
    %c0_0 = arith.constant 0 : index
    %0 = memref.load %arg1[%c0, %c0_0] : memref<1x1xf32, #tpu.memory_space<smem>>
    %c0_1 = arith.constant 0 : index
    %c0_2 = arith.constant 0 : index
    %1 = vector.load %arg2[%c0_1, %c0_2] : memref<8x32xf32, #tpu.memory_space<vmem>>, vector<8x32xf32>
    %2 = arith.truncf %1 : vector<8x32xf32> to vector<8x32xbf16>
    %c0_3 = arith.constant 0 : index
    %c0_4 = arith.constant 0 : index
    %3 = vector.load %arg3[%c0_3, %c0_4] : memref<32x256xbf16, #tpu.memory_space<vmem>>, vector<32x256xbf16>
    %cst = arith.constant dense<0.000000e+00> : vector<8x256xf32>
    %4 = tpu.matmul %2, %3, %cst {dimension_numbers = #tpu.dot_dimension_numbers<[1], [0], [0], [1], [0, 0, 1, 1], [], []>} : vector<8x32xbf16>, vector<32x256xbf16>, vector<8x256xf32> -> vector<8x256xf32>
    %c0_5 = arith.constant 0 : index
    %c0_6 = arith.constant 0 : index
    %5 = vector.load %arg4[%c0_5, %c0_6] : memref<1x256xf32, #tpu.memory_space<vmem>>, vector<1x256xf32>
    %6 = vector.broadcast %5 : vector<1x256xf32> to vector<8x256xf32>
    %7 = arith.addf %4, %6 : vector<8x256xf32>
    %cst_7 = arith.constant 0.000000e+00 : f32
    %8 = vector.broadcast %cst_7 : f32 to vector<8x256xf32>
    %9 = arith.maximumf %7, %8 : vector<8x256xf32>
    %10 = arith.truncf %9 : vector<8x256xf32> to vector<8x256xbf16>
    %c0_8 = arith.constant 0 : index
    %c0_9 = arith.constant 0 : index
    %11 = vector.load %arg5[%c0_8, %c0_9] : memref<256x256xbf16, #tpu.memory_space<vmem>>, vector<256x256xbf16>
    %cst_10 = arith.constant dense<0.000000e+00> : vector<8x256xf32>
    %12 = tpu.matmul %10, %11, %cst_10 {dimension_numbers = #tpu.dot_dimension_numbers<[1], [0], [0], [1], [0, 0, 1, 1], [], []>} : vector<8x256xbf16>, vector<256x256xbf16>, vector<8x256xf32> -> vector<8x256xf32>
    %c0_11 = arith.constant 0 : index
    %c0_12 = arith.constant 0 : index
    %13 = vector.load %arg6[%c0_11, %c0_12] : memref<1x256xf32, #tpu.memory_space<vmem>>, vector<1x256xf32>
    %14 = vector.broadcast %13 : vector<1x256xf32> to vector<8x256xf32>
    %15 = arith.addf %12, %14 : vector<8x256xf32>
    %cst_13 = arith.constant 0.000000e+00 : f32
    %16 = vector.broadcast %cst_13 : f32 to vector<8x256xf32>
    %17 = arith.maximumf %15, %16 : vector<8x256xf32>
    %18 = arith.truncf %17 : vector<8x256xf32> to vector<8x256xbf16>
    %c0_14 = arith.constant 0 : index
    %c0_15 = arith.constant 0 : index
    %19 = vector.load %arg7[%c0_14, %c0_15] : memref<256x128xbf16, #tpu.memory_space<vmem>>, vector<256x128xbf16>
    %cst_16 = arith.constant dense<0.000000e+00> : vector<8x128xf32>
    %20 = tpu.matmul %18, %19, %cst_16 {dimension_numbers = #tpu.dot_dimension_numbers<[1], [0], [0], [1], [0, 0, 1, 1], [], []>} : vector<8x256xbf16>, vector<256x128xbf16>, vector<8x128xf32> -> vector<8x128xf32>
    %c0_17 = arith.constant 0 : index
    %c0_18 = arith.constant 0 : index
    %21 = vector.load %arg8[%c0_17, %c0_18] : memref<1x128xf32, #tpu.memory_space<vmem>>, vector<1x128xf32>
    %22 = vector.broadcast %21 : vector<1x128xf32> to vector<8x128xf32>
    %23 = arith.addf %20, %22 : vector<8x128xf32>
    %24 = math.tanh %23 : vector<8x128xf32>
    %25 = vector.broadcast %0 : f32 to vector<8x128xf32>
    %26 = arith.mulf %25, %24 : vector<8x128xf32>
    %c0_19 = arith.constant 0 : index
    %c0_20 = arith.constant 0 : index
    %27 = vector.load %arg9[%c0_19, %c0_20] : memref<8x128xf32, #tpu.memory_space<vmem>>, vector<8x128xf32>
    tpu.vector_store %arg9[%c0_19, %c0_20], %26 {strides = array<i32>} : memref<8x128xf32, #tpu.memory_space<vmem>>, vector<8x128xf32>,
    return
  }
  func.func @transform_0(%arg0: i32) -> (i32, i32) {
    %c0_i32 = arith.constant 0 : i32
    %c0_i32_0 = arith.constant 0 : i32
    %c0_i32_1 = arith.constant 0 : i32
    return %c0_i32, %c0_i32_0 : i32, i32
  }
  func.func @transform_1(%arg0: i32) -> (i32, i32) {
    %c0_i32 = arith.constant 0 : i32
    %c0_i32_0 = arith.constant 0 : i32
    return %arg0, %c0_i32 : i32, i32
  }
  func.func @transform_2(%arg0: i32) -> (i32, i32) {
    %c0_i32 = arith.constant 0 : i32
    %c0_i32_0 = arith.constant 0 : i32
    %c0_i32_1 = arith.constant 0 : i32
    return %c0_i32, %c0_i32_0 : i32, i32
  }
  func.func @transform_3(%arg0: i32) -> (i32, i32) {
    %c0_i32 = arith.constant 0 : i32
    %c0_i32_0 = arith.constant 0 : i32
    %c0_i32_1 = arith.constant 0 : i32
    return %c0_i32, %c0_i32_0 : i32, i32
  }
  func.func @transform_4(%arg0: i32) -> (i32, i32) {
    %c0_i32 = arith.constant 0 : i32
    %c0_i32_0 = arith.constant 0 : i32
    %c0_i32_1 = arith.constant 0 : i32
    return %c0_i32, %c0_i32_0 : i32, i32
  }
  func.func @transform_5(%arg0: i32) -> (i32, i32) {
    %c0_i32 = arith.constant 0 : i32
    %c0_i32_0 = arith.constant 0 : i32
    %c0_i32_1 = arith.constant 0 : i32
    return %c0_i32, %c0_i32_0 : i32, i32
  }
  func.func @transform_6(%arg0: i32) -> (i32, i32) {
    %c0_i32 = arith.constant 0 : i32
    %c0_i32_0 = arith.constant 0 : i32
    %c0_i32_1 = arith.constant 0 : i32
    return %c0_i32, %c0_i32_0 : i32, i32
  }
  func.func @transform_7(%arg0: i32) -> (i32, i32) {
    %c0_i32 = arith.constant 0 : i32
    %c0_i32_0 = arith.constant 0 : i32
    %c0_i32_1 = arith.constant 0 : i32
    return %c0_i32, %c0_i32_0 : i32, i32
  }
  func.func @transform_8(%arg0: i32) -> (i32, i32) {
    %c0_i32 = arith.constant 0 : i32
    %c0_i32_0 = arith.constant 0 : i32
    return %arg0, %c0_i32 : i32, i32
  }
}

</mosaic_0001>

<bundles_post_ra>
// kernel: tpu_custom_call.1
= control target key start
LH: loop header
LB: loop body
LE: loop exit
PB: predicated region body
PF: predicated region fallthrough
CT: control target
= control target key end

     0   :  { %14 = vsyncpa [#allocation4], 0  ;;  %s1027_s0 = inlined_call_operand.<no memory space> [shape: f32[1,1], index: 0, kind: input, shape index: {}]   ;;  %s1028_s1 = inlined_call_operand.hbm [shape: f32[8,32], index: 1, kind: input, shape index: {}]   ;;  %s1029_s2 = inlined_call_operand.hbm [shape: bf16[32,256], index: 2, kind: input, shape index: {}]   ;;  %s1030_s3 = inlined_call_operand.vmem [shape: f32[1,256], index: 3, kind: input, shape index: {}]   ;;  %s1031_s4 = inlined_call_operand.hbm [shape: bf16[256,256], index: 4, kind: input, shape index: {}]   ;;  %s1032_s5 = inlined_call_operand.vmem [shape: f32[1,256], index: 5, kind: input, shape index: {}]   ;;  %s1033_s6 = inlined_call_operand.hbm [shape: bf16[256,128], index: 6, kind: input, shape index: {}]   ;;  %s1034_s7 = inlined_call_operand.vmem [shape: f32[1,128], index: 7, kind: input, shape index: {}]   ;;  %s1035_s8 = inlined_call_operand.hbm [shape: f32[8,128], index: 8, kind: output, shape index: {}]  }
   0x1   :  { %15 = vsyncpa [#allocation7], 0 }
   0x2   :  { %16 = vsyncpa [#allocation10], 0 }
   0x3   :  { %17 = vsyncpa [#allocation5], 0  ;;  %s894_s27 = smov [#allocation6]   ;;  %s776_s9 = scalar_lea.hbm %s1029_s2, 512 }
   0x4   :  { %s35_s28 = sshll.u32 %s894_s27, 4  ;;  %p777_p0 = scmp.ne.s32.totalorder %s1029_s2, %s776_s9  ;;  %s36_s28 = int_to_ptr.vmem [resolvable:$true] %s35_s28 }
   0x5   :  { %p780_p1 = scmp.lt.u32.totalorder %s776_s9, %s1029_s2 }
   0x7   :  { %p782_p2 = pnand %p780_p1, %p777_p0 }
   0x9   :  { %785 = shalt.err (!%p782_p2)
}
   0xa   :  { %s786_s14 = scalar_lea.vmem %s36_s28, 512  ;;  %p791_p4 = scmp.lt.s32.totalorder %s36_s28, %s36_s28 }
   0xb   :  { %p787_p3 = scmp.ne.s32.totalorder %s36_s28, %s786_s14  ;;  %p792_p5 = scmp.lt.s32.totalorder %s786_s14, %s786_s14 }
   0xd   :  { %p793_p6 = por %p792_p5, %p791_p4 }
   0xf   :  { %p794_p7 = pnand %p793_p6, %p787_p3 }
  0x11   :  { %797 = shalt.err (!%p794_p7)
}
  0x12   :  { %s895_s15 = smov 128   ;;  %s896_s16 = smov 8  }
  0x13   :  { %41 = dma.hbm_to_vmem [thread:$0]  %s1029_s2, 512, %s36_s28, [#allocation7], %s895_s15, %s895_s15, %s896_s16  }
  0x14   :  { %s897_s19 = smov [#allocation3]   ;;  %s898_s21 = smov [#allocation8]  }
  0x15   :  { %s26_s20 = sshll.u32 %s897_s19, 4  ;;  %s49_s22 = sshll.u32 %s898_s21, 4  ;;  %s27_s20 = int_to_ptr.vmem [resolvable:$true] %s26_s20  ;;  %s50_s22 = int_to_ptr.vmem [resolvable:$true] %s49_s22 }
  0x16   :  { %s798_s25 = scalar_lea.hbm %s1028_s1, 128 }
  0x17   :  { %p799_p8 = scmp.ne.s32.totalorder %s1028_s1, %s798_s25  ;;  %p802_p9 = scmp.lt.u32.totalorder %s798_s25, %s1028_s1 }
  0x19   :  { %p804_p10 = pnand %p802_p9, %p799_p8 }
  0x1b   :  { %807 = shalt.err (!%p804_p10)
}
  0x1c   :  { %s808_s2 = scalar_lea.vmem %s27_s20, 128  ;;  %p813_p12 = scmp.lt.s32.totalorder %s27_s20, %s27_s20 }
  0x1d   :  { %p809_p11 = scmp.ne.s32.totalorder %s27_s20, %s808_s2  ;;  %p814_p13 = scmp.lt.s32.totalorder %s808_s2, %s808_s2 }
  0x1f   :  { %p815_p0 = por %p814_p13, %p813_p12 }
  0x21   :  { %p816_p1 = pnand %p815_p0, %p809_p11 }
  0x23   :  { %819 = shalt.err (!%p816_p1)
}
  0x24   :  { %29 = dma.hbm_to_vmem [thread:$0]  %s1028_s1, 128, %s27_s20, [#allocation4]  }
  0x25   :  { %s820_s12 = scalar_lea.hbm %s1031_s4, 4096 }
  0x26   :  { %p821_p2 = scmp.ne.s32.totalorder %s1031_s4, %s820_s12  ;;  %p824_p3 = scmp.lt.u32.totalorder %s820_s12, %s1031_s4 }
  0x28   :  { %p826_p4 = pnand %p824_p3, %p821_p2 }
  0x2a   :  { %829 = shalt.err (!%p826_p4)
}
  0x2b   :  { %s830_s19 = scalar_lea.vmem %s50_s22, 4096  ;;  %p835_p6 = scmp.lt.s32.totalorder %s50_s22, %s50_s22 }
  0x2c   :  { %p831_p5 = scmp.ne.s32.totalorder %s50_s22, %s830_s19  ;;  %p836_p7 = scmp.lt.s32.totalorder %s830_s19, %s830_s19 }
  0x2e   :  { %p837_p8 = por %p836_p7, %p835_p6 }
  0x30   :  { %p838_p9 = pnand %p837_p8, %p831_p5 }
  0x32   :  { %841 = shalt.err (!%p838_p9)
}
  0x33   :  { %55 = dma.hbm_to_vmem [thread:$0]  %s1031_s4, 4096, %s50_s22, [#allocation7], %s895_s15, %s895_s15, %s896_s16  }
  0x34   :  { %s899_s21 = smov [#allocation9]   ;;  %s842_s26 = scalar_lea.hbm %s1033_s6, 2048 }
  0x35   :  { %s63_s23 = sshll.u32 %s899_s21, 4  ;;  %p843_p10 = scmp.ne.s32.totalorder %s1033_s6, %s842_s26  ;;  %s64_s23 = int_to_ptr.vmem [resolvable:$true] %s63_s23 }
  0x36   :  { %p846_p11 = scmp.lt.u32.totalorder %s842_s26, %s1033_s6 }
  0x38   :  { %p848_p12 = pnand %p846_p11, %p843_p10 }
  0x3a   :  { %851 = shalt.err (!%p848_p12)
}
  0x3b   :  { %s852_s28 = scalar_lea.vmem %s64_s23, 2048  ;;  %p857_p0 = scmp.lt.s32.totalorder %s64_s23, %s64_s23 }
  0x3c   :  { %p853_p13 = scmp.ne.s32.totalorder %s64_s23, %s852_s28  ;;  %p858_p1 = scmp.lt.s32.totalorder %s852_s28, %s852_s28 }
  0x3e   :  { %p859_p2 = por %p858_p1, %p857_p0 }
  0x40   :  { %p860_p3 = pnand %p859_p2, %p853_p13 }
  0x42   :  { %863 = shalt.err (!%p860_p3)
}
  0x43   :  { %s900_s4 = smov 64   ;;  %s901_s15 = smov 4  }
  0x44   :  { %69 = dma.hbm_to_vmem [thread:$0]  %s1033_s6, 2048, %s64_s23, [#allocation10], %s900_s4, %s900_s4, %s901_s15  }
  0x45   :  { %886 = dma.done.wait [#allocation4], 128  }
  0x46   :  { %887 = vsyncadd [#allocation4], 4294967168 }
  0x47   :  { %888 = dma.done.wait [#allocation7], 4608  }
  0x48   :  { %889 = vsyncadd [#allocation7], 4294962688 }
  0x49   :  { %890 = dma.done.wait [#allocation10], 2048  }
  0x4a   :  { %891 = vsyncadd [#allocation10], 4294965248  ;;  %v902_v0 = vmov 0   ;;  %v704_v1 = vld [vmem:[#allocation6 + $0x4] ss:$8 sps:$4 sm:$0xff]   ;;  %v86_v5 = vld [vmem:[#allocation3] sm:$0xff]  ;;  %v94_v51 = vlaneseq }
  0x4b   :  { %160 = vmatprep.mubr.bf16.mxu0 %v902_v0  ;;  %v706_v2 = vld [vmem:[#allocation6] ss:$8 sps:$4 sm:$0xff]   ;;  %128 = vmatprep.subr.bf16.mxu0 %v704_v1  ;;  %v707_v3 = vld [vmem:[#allocation6 + $0x14] ss:$8 sps:$4 sm:$0xff]   ;;  %v709_v4 = vld [vmem:[#allocation6 + $0x10] ss:$8 sps:$4 sm:$0xff]   ;;  %v87_v9 = vpack.c.bf16 %v86_v5, %v86_v5 }
  0x4c   :  { %129 = vmatpush1.bf16.msra.mxu0 %v706_v2  ;;  %v710_v6 = vld [vmem:[#allocation8 + $0x4] ss:$8 sps:$4 sm:$0xff]   ;;  %v712_v7 = vld [vmem:[#allocation8] ss:$8 sps:$4 sm:$0xff]   ;;  %v713_v8 = vld [vmem:[#allocation8 + $0x14] ss:$8 sps:$4 sm:$0xff]  }
  0x4d   :  { %130 = vmatprep.subr.bf16.mxu0 %v707_v3  ;;  %377 = vmatprep.subr.bf16.mxu1 %v710_v6  ;;  %v715_v10 = vld [vmem:[#allocation8 + $0x10] ss:$8 sps:$4 sm:$0xff]   ;;  %vm124_vm0 = vcmask 261120   ;;  %v716_v11 = vld [vmem:[#allocation8 + $0x24] ss:$8 sps:$4 sm:$0xff]   ;;  %v95_v52 = vshrl.u32 %v94_v51, 7 }
  0x4e   :  { %378 = vmatpush1.bf16.msra.mxu1 %v712_v7  ;;  %v718_v12 = vld [vmem:[#allocation8 + $0x20] ss:$8 sps:$4 sm:$0xff]   ;;  %v719_v13 = vld [vmem:[#allocation8 + $0x34] ss:$8 sps:$4 sm:$0xff]   ;;  %v721_v14 = vld [vmem:[#allocation8 + $0x30] ss:$8 sps:$4 sm:$0xff]  }
  0x4f   :  { %379 = vmatprep.subr.bf16.mxu1 %v713_v8  ;;  %v722_v15 = vld [vmem:[#allocation8 + $0x44] ss:$8 sps:$4 sm:$0xff]   ;;  %v724_v16 = vld [vmem:[#allocation8 + $0x40] ss:$8 sps:$4 sm:$0xff]   ;;  %v725_v17 = vld [vmem:[#allocation8 + $0x54] ss:$8 sps:$4 sm:$0xff]  }
  0x50   :  { %131 = vmatpush1.bf16.msra.mxu0 %v709_v4  ;;  %v727_v18 = vld [vmem:[#allocation8 + $0x50] ss:$8 sps:$4 sm:$0xff]   ;;  %v728_v19 = vld [vmem:[#allocation8 + $0x64] ss:$8 sps:$4 sm:$0xff]   ;;  %v730_v20 = vld [vmem:[#allocation8 + $0x60] ss:$8 sps:$4 sm:$0xff]  }
  0x51   :  { %v731_v21 = vld [vmem:[#allocation8 + $0x74] ss:$8 sps:$4 sm:$0xff]   ;;  %v733_v22 = vld [vmem:[#allocation8 + $0x70] ss:$8 sps:$4 sm:$0xff]   ;;  %v734_v23 = vld [vmem:[#allocation8 + $0x84] ss:$8 sps:$4 sm:$0xff]  }
  0x52   :  { %380 = vmatpush1.bf16.msra.mxu1 %v715_v10  ;;  %v736_v24 = vld [vmem:[#allocation8 + $0x80] ss:$8 sps:$4 sm:$0xff]   ;;  %v737_v25 = vld [vmem:[#allocation8 + $0x94] ss:$8 sps:$4 sm:$0xff]   ;;  %v739_v26 = vld [vmem:[#allocation8 + $0x90] ss:$8 sps:$4 sm:$0xff]  }
  0x53   :  { %622 = vmatmul.mubr.msk.bf16.vlgmr.msra.gmra.mrb[0].mxu0 %vm124_vm0, %v87_v9  ;;  %381 = vmatprep.subr.bf16.mxu1 %v716_v11  ;;  %v740_v27 = vld [vmem:[#allocation8 + $0xa4] ss:$8 sps:$4 sm:$0xff]   ;;  %v742_v28 = vld [vmem:[#allocation8 + $0xa0] ss:$8 sps:$4 sm:$0xff]   ;;  %v743_v29 = vld [vmem:[#allocation8 + $0xb4] ss:$8 sps:$4 sm:$0xff]  }
  0x54   :  { %v745_v30 = vld [vmem:[#allocation8 + $0xb0] ss:$8 sps:$4 sm:$0xff]   ;;  %v746_v31 = vld [vmem:[#allocation8 + $0xc4] ss:$8 sps:$4 sm:$0xff]   ;;  %v748_v32 = vld [vmem:[#allocation8 + $0xc0] ss:$8 sps:$4 sm:$0xff]  }
  0x55   :  { %v749_v33 = vld [vmem:[#allocation8 + $0xd4] ss:$8 sps:$4 sm:$0xff]   ;;  %v751_v34 = vld [vmem:[#allocation8 + $0xd0] ss:$8 sps:$4 sm:$0xff]   ;;  %v752_v35 = vld [vmem:[#allocation8 + $0xe4] ss:$8 sps:$4 sm:$0xff]  }
  0x56   :  { %382 = vmatpush1.bf16.msra.mxu1 %v718_v12  ;;  %v754_v36 = vld [vmem:[#allocation8 + $0xe0] ss:$8 sps:$4 sm:$0xff]   ;;  %v755_v37 = vld [vmem:[#allocation8 + $0xf4] ss:$8 sps:$4 sm:$0xff]   ;;  %v757_v38 = vld [vmem:[#allocation8 + $0xf0] ss:$8 sps:$4 sm:$0xff]  }
  0x57   :  { %383 = vmatprep.subr.bf16.mxu1 %v719_v13  ;;  %v758_v39 = vld [vmem:[#allocation9 + $0x40] sm:$0xff]   ;;  %v760_v41 = vld [vmem:[#allocation9 + $0x48] sm:$0xff]   ;;  %v762_v43 = vld [vmem:[#allocation9 + $0x50] sm:$0xff]   ;;  %v96_v53 = vsub.s32 0, %v95_v52  ;;  %v100_v55 = vsub.s32 1, %v95_v52  ;;  %s903_s14 = smov [#allocation11]  }
  0x58   :  { %v759_v40 = vld [vmem:[#allocation9] sm:$0xff]   ;;  %672 = vmatprep.subr.bf16.mxu0 %v758_v39  ;;  %v761_v42 = vld [vmem:[#allocation9 + $0x8] sm:$0xff]   ;;  %v763_v44 = vld [vmem:[#allocation9 + $0x10] sm:$0xff]   ;;  %s607_s17 = sshll.u32 %s903_s14, 4  ;;  %s608_s17 = int_to_ptr.vmem [resolvable:$true] %s607_s17 }
  0x59   :  { %673 = vmatpush3.bf16.msra.mxu0 %v759_v40  ;;  %v764_v45 = vld [vmem:[#allocation9 + $0x58] sm:$0xff]   ;;  %v766_v47 = vld [vmem:[#allocation9 + $0x60] sm:$0xff]   ;;  %v768_v49 = vld [vmem:[#allocation9 + $0x68] sm:$0xff]   ;;  %s864_s18 = scalar_lea.vmem %s608_s17, 128  ;;  %p869_p5 = scmp.lt.s32.totalorder %s608_s17, %s608_s17 }
  0x5a   :  { %384 = vmatpush1.bf16.msra.mxu1 %v721_v14  ;;  %674 = vmatprep.subr.bf16.mxu0 %v760_v41  ;;  %v765_v46 = vld [vmem:[#allocation9 + $0x18] sm:$0xff]   ;;  %v767_v48 = vld [vmem:[#allocation9 + $0x20] sm:$0xff]   ;;  %v769_v50 = vld [vmem:[#allocation9 + $0x28] sm:$0xff]   ;;  %p865_p4 = scmp.ne.s32.totalorder %s608_s17, %s864_s18  ;;  %p870_p6 = scmp.lt.s32.totalorder %s864_s18, %s864_s18 }
  0x5b   :  { %385 = vmatprep.subr.bf16.mxu1 %v722_v15  ;;  %v92_v54 = vld [vmem:[%s1030_s3] sm:$0x3]  ;;  %v770_v4 = vld [vmem:[#allocation9 + $0x70] sm:$0xff]  }
  0x5c   :  { %v97_v56 = vrot.slane %v92_v54, %v96_v53  ;;  %v101_v57 = vrot.slane %v92_v54, %v100_v55  ;;  %v771_v5 = vld [vmem:[#allocation9 + $0x30] sm:$0xff]   ;;  %v772_v6 = vld [vmem:[#allocation9 + $0x78] sm:$0xff]   ;;  %p871_p7 = por %p870_p6, %p869_p5 }
  0x5d   :  { %675 = vmatpush3.bf16.msra.mxu0 %v761_v42  ;;  %v773_v7 = vld [vmem:[#allocation9 + $0x38] sm:$0xff]  }
  0x5e   :  { %386 = vmatpush1.bf16.msra.mxu1 %v724_v16  ;;  %676 = vmatprep.subr.bf16.mxu0 %v762_v43  ;;  %v205_v8 = vld [vmem:[%s1032_s5] sm:$0x3]  ;;  %p872_p8 = pnand %p871_p7, %p865_p4 }
  0x5f   :  { %387 = vmatprep.subr.bf16.mxu1 %v725_v17  ;;  %v210_v9 = vrot.slane %v205_v8, %v96_v53  ;;  %v214_v10 = vrot.slane %v205_v8, %v100_v55 }
  0x61   :  { %677 = vmatpush3.bf16.msra.mxu0 %v763_v44 }
  0x62   :  { %388 = vmatpush1.bf16.msra.mxu1 %v727_v18  ;;  %678 = vmatprep.subr.bf16.mxu0 %v764_v45 }
  0x63   :  { %389 = vmatprep.subr.bf16.mxu1 %v728_v19 }
  0x65   :  { %679 = vmatpush3.bf16.msra.mxu0 %v765_v46 }
  0x66   :  { %390 = vmatpush1.bf16.msra.mxu1 %v730_v20  ;;  %680 = vmatprep.subr.bf16.mxu0 %v766_v47 }
  0x67   :  { %391 = vmatprep.subr.bf16.mxu1 %v731_v21 }
  0x69   :  { %681 = vmatpush3.bf16.msra.mxu0 %v767_v48 }
  0x6a   :  { %392 = vmatpush1.bf16.msra.mxu1 %v733_v22  ;;  %682 = vmatprep.subr.bf16.mxu0 %v768_v49  ;;  %v655_v22 = vld [vmem:[%s1034_s7] ss:$0 sm:$0xff] }
  0x6b   :  { %393 = vmatprep.subr.bf16.mxu1 %v734_v23 }
  0x6d   :  { %683 = vmatpush3.bf16.msra.mxu0 %v769_v50 }
  0x6e   :  { %394 = vmatpush1.bf16.msra.mxu1 %v736_v24  ;;  %684 = vmatprep.subr.bf16.mxu0 %v770_v4 }
  0x6f   :  { %395 = vmatprep.subr.bf16.mxu1 %v737_v25 }
  0x71   :  { %685 = vmatpush3.bf16.msra.mxu0 %v771_v5 }
  0x72   :  { %396 = vmatpush1.bf16.msra.mxu1 %v739_v26  ;;  %686 = vmatprep.subr.bf16.mxu0 %v772_v6 }
  0x73   :  { %397 = vmatprep.subr.bf16.mxu1 %v740_v27 }
  0x75   :  { %687 = vmatpush3.bf16.msra.mxu0 %v773_v7 }
  0x76   :  { %398 = vmatpush1.bf16.msra.mxu1 %v742_v28  ;;  %v598_v28 = vstv %s1027_s0 }
  0x77   :  { %399 = vmatprep.subr.bf16.mxu1 %v743_v29 }
  0x7a   :  { %400 = vmatpush1.bf16.msra.mxu1 %v745_v30 }
  0x7b   :  { %401 = vmatprep.subr.bf16.mxu1 %v746_v31 }
  0x7e   :  { %402 = vmatpush1.bf16.msra.mxu1 %v748_v32 }
  0x7f   :  { %403 = vmatprep.subr.bf16.mxu1 %v749_v33 }
  0x82   :  { %404 = vmatpush1.bf16.msra.mxu1 %v751_v34 }
  0x83   :  { %405 = vmatprep.subr.bf16.mxu1 %v752_v35 }
  0x86   :  { %406 = vmatpush1.bf16.msra.mxu1 %v754_v36 }
  0x87   :  { %407 = vmatprep.subr.bf16.mxu1 %v755_v37 }
  0x8a   :  { %408 = vmatpush1.bf16.msra.mxu1 %v757_v38 }
 0x126   :  { %v162_v58 = vpop.f32.mrb[0].mxu0 }
 0x127   :  { %v163_v59 = vadd.f32 %v162_v58, %v97_v56  ;;  %v164_v60 = vpop.f32.mrb[1].mxu0 }
 0x128   :  { %v165_v61 = vadd.f32 %v164_v60, %v101_v57  ;;  %v166_v62 = vpop.f32.mrb[2].mxu0 }
 0x129   :  { %v169_v63 = vmax.f32 %v163_v59, 0.0  ;;  %v167_v0 = vpop.f32.mrb[3].mxu0 }
 0x12a   :  { %v170_v1 = vmax.f32 %v165_v61, 0.0 }
 0x12b   :  { %v171_v3 = vpack.c.bf16 %v169_v63, %v169_v63 }
 0x12c   :  { %v172_v2 = vpack.c.bf16 %v170_v1, %v170_v1 }
 0x12e   :  { %409 = vmatprep.mubr.bf16.mxu1 %v172_v2 }
 0x12f   :  { %410 = vmatmul.mubr.bf16.vlgmr.msra.gmra.mrb[0].mxu1 %v171_v3 }
 0x202   :  { %v411_v11 = vpop.f32.mrb[0].mxu1 }
 0x203   :  { %v412_v12 = vadd.f32 %v411_v11, %v210_v9  ;;  %v413_v13 = vpop.f32.mrb[1].mxu1 }
 0x204   :  { %v414_v14 = vadd.f32 %v413_v13, %v214_v10  ;;  %v415_v15 = vpop.f32.mrb[2].mxu1 }
 0x205   :  { %v418_v16 = vmax.f32 %v412_v12, 0.0  ;;  %v416_v17 = vpop.f32.mrb[3].mxu1 }
 0x206   :  { %v419_v18 = vmax.f32 %v414_v14, 0.0 }
 0x207   :  { %v420_v20 = vpack.c.bf16 %v418_v16, %v418_v16 }
 0x208   :  { %v421_v19 = vpack.c.bf16 %v419_v18, %v419_v18 }
 0x20a   :  { %589 = vmatprep.mubr.bf16.mxu0 %v421_v19 }
 0x20b   :  { %590 = vmatmul.mubr.bf16.vlgmr.msra.gmra.mrb[4].mxu0 %v420_v20 }
 0x2de   :  { %v688_v21 = vpop.f32.mrb[4].mxu0 }
 0x2df   :  { %v689_v23 = vpop.f32.mrb[5].mxu0 }
 0x2e0   :  { %v690_v24 = vadd.f32 %v689_v23, %v688_v21  ;;  %v691_v25 = vpop.f32.mrb[6].mxu0 }
 0x2e1   :  { %v692_v26 = vpop.f32.mrb[7].mxu0 }
 0x2e2   :  { %v592_v27 = vadd.f32 %v690_v24, %v655_v22 }
 0x2e4   :  { %774 = vtanh.f32 %v592_v27 }
 0x2ee   :  { %v775_v29 = vpop.eup %774 }
 0x2ef   :  { %v599_v30 = vmul.f32 %v775_v29, %v598_v28 }
 0x2f1   :  { %600 = vst [vmem:[#allocation11] sm:$0xff] %v599_v30 }
 0x2f2   :  { %875 = shalt.err (!%p872_p8)
}
 0x2f3   :  { %s876_s1 = scalar_lea.hbm %s1035_s8, 128 }
 0x2f4   :  { %p877_p9 = scmp.ne.s32.totalorder %s1035_s8, %s876_s1  ;;  %p880_p10 = scmp.lt.u32.totalorder %s876_s1, %s1035_s8 }
 0x2f6   :  { %p882_p11 = pnand %p880_p10, %p877_p9 }
 0x2f8   :  { %885 = shalt.err (!%p882_p11)
}
 0x2f9   :  { %610 = dma.vmem_to_hbm [thread:$0]  %s608_s17, 128, %s1035_s8, [#allocation5]  }
 0x2fa   :  { %892 = dma.done.wait [#allocation5], 128  }
 0x2fb   :  { %893 = vsyncadd [#allocation5], 4294967168 }
 0x2fc   :  { %614 = vsyncpa [#allocation4], 1 }
 0x2fd   :  { %615 = vsyncpa [#allocation7], 1 }
 0x2fe   :  { %616 = vsyncpa [#allocation10], 1 }
 0x2ff   :  { %617 = vsyncpa [#allocation5], 1 }

</bundles_post_ra>
